<compile_context>
chip_gen: v7x
topology: tpu7x:2x2x1
jax: 0.10.0
libtpu: 0.0.40
codegen_flags: <defaults>
</compile_context>

<pallas_src>
import math

import jax
import jax.numpy as jnp
from jax.experimental import pallas as pl
from jax.experimental.pallas import tpu as pltpu


def _self_attention_kernel(he_ref, hl_ref, hi_ref, hm_ref, wq_ref, wkv_ref,
                           out_ref):
    Bblk, Se, D = he_ref.shape
    D3 = hl_ref.shape[-1]
    Sc = hl_ref.shape[1] + hi_ref.shape[1] + hm_ref.shape[1]
    op_dtype = he_ref.dtype  # MXU operand dtype (bf16-native if inputs are bf16)

    he = he_ref[...]                                           # (Bblk, Se, D)
    # Assemble the K/V context in VMEM (no HBM->HBM concat in the wrapper).
    hc = jnp.concatenate([hl_ref[...], hi_ref[...], hm_ref[...]], axis=1)
    # hc: (Bblk, Sc, D3)

    # Flattened projections: one (Bblk*Se, D) x (D, D) matmul for Q (scale
    # already folded into the weight) and one fused (Bblk*Sc, D3) x (D3, 2D)
    # matmul for K|V, f32 accumulation on the MXU.
    q2d = jnp.dot(he.reshape(Bblk * Se, D), wq_ref[...],
                  preferred_element_type=jnp.float32)          # (Bblk*Se, D)
    kv2d = jnp.dot(hc.reshape(Bblk * Sc, D3), wkv_ref[...],
                   preferred_element_type=jnp.float32)         # (Bblk*Sc, 2D)

    q = q2d.reshape(Bblk, Se, D)
    kv = kv2d.reshape(Bblk, Sc, 2 * D)
    k = kv[:, :, :D]
    v = kv[:, :, D:]

    # Scores via batched contraction (no explicit k.T); accumulate in f32.
    scores = jnp.einsum('bqd,bkd->bqk',
                        q.astype(op_dtype), k.astype(op_dtype),
                        preferred_element_type=jnp.float32)    # (Bblk, Se, Sc)

    # Stable softmax; elementwise math stays in f32.
    scores = scores - jnp.max(scores, axis=-1, keepdims=True)
    p = jnp.exp(scores)
    inv_denom = pl.reciprocal(jnp.sum(p, axis=-1, keepdims=True), approx=True)
    p = p * inv_denom

    z = jnp.einsum('bqk,bkd->bqd',
                   p.astype(op_dtype), v.astype(op_dtype),
                   preferred_element_type=jnp.float32)         # (Bblk, Se, D)

    # Residual add + store.
    out_ref[...] = (he.astype(jnp.float32) + z).astype(out_ref.dtype)


def self_attention_layer(h_e, h_l, h_i, h_m, length, params):
    """Pallas equivalent of SelfAttentionLayer.forward (qkv_diff=True)."""
    del length  # unused in the qkv_diff=True branch of the PyTorch module
    wq_t, wk_t, wv_t = params          # (D,D), (3D,D), (3D,D), pre-transposed

    B, Se, D = h_e.shape
    Sl, Si, Sm = h_l.shape[1], h_i.shape[1], h_m.shape[1]
    D3 = h_l.shape[-1]

    # Fold the 1/sqrt(D) softmax scale into the Q weight (one-time, weight
    # sized), and fuse the K and V projection weights into one (3D, 2D)
    # weight so the context is swept by the MXU once per grid step.
    wq_scaled = wq_t * (1.0 / math.sqrt(D))                    # (D, D)
    wkv_t = jnp.concatenate([wk_t, wv_t], axis=1)              # (D3, 2D)

    # Block several batch elements per grid step to amortize per-step pipeline
    # overhead and fill MXU sublanes (largest divisor of B up to 8).
    Bblk = max(c for c in range(1, min(B, 8) + 1) if B % c == 0)
    grid = (B // Bblk,)

    h_e_out = pl.pallas_call(
        _self_attention_kernel,
        out_shape=jax.ShapeDtypeStruct((B, Se, D), h_e.dtype),
        grid_spec=pltpu.PrefetchScalarGridSpec(
            num_scalar_prefetch=0,
            grid=grid,
            in_specs=[
                pl.BlockSpec((Bblk, Se, D), lambda b: (b, 0, 0)),
                pl.BlockSpec((Bblk, Sl, D3), lambda b: (b, 0, 0)),
                pl.BlockSpec((Bblk, Si, D3), lambda b: (b, 0, 0)),
                pl.BlockSpec((Bblk, Sm, D3), lambda b: (b, 0, 0)),
                pl.BlockSpec((D, D), lambda b: (0, 0)),
                pl.BlockSpec((D3, 2 * D), lambda b: (0, 0)),
            ],
            out_specs=pl.BlockSpec((Bblk, Se, D), lambda b: (b, 0, 0)),
        ),
        compiler_params=pltpu.CompilerParams(
            dimension_semantics=("parallel",)),
    )(h_e, h_l, h_i, h_m, wq_scaled, wkv_t)

    return h_e_out, h_l, h_i, h_m


if __name__ == "__main__":
    # Small shapes consistent with the module:
    #   h_e: (B, Se, D), h_l/h_i/h_m: (B, S*, 3*D)  (Wk/Wv take 3*D inputs).
    B, Se, Sl, Si, Sm, D = 2, 8, 2, 3, 3, 8
    D3 = 3 * D

    key = jax.random.PRNGKey(0)
    k_he, k_hl, k_hi, k_hm, k_wq, k_wk, k_wv = jax.random.split(key, 7)

    h_e = jax.random.normal(k_he, (B, Se, D), jnp.float32)
    h_l = jax.random.normal(k_hl, (B, Sl, D3), jnp.float32)
    h_i = jax.random.normal(k_hi, (B, Si, D3), jnp.float32)
    h_m = jax.random.normal(k_hm, (B, Sm, D3), jnp.float32)

    # Deterministic kaiming-normal-style init (std = sqrt(2 / fan_in)),
    # PyTorch weight shape convention (out_features, in_features).
    wq = jax.random.normal(k_wq, (D, D), jnp.float32) * math.sqrt(2.0 / D)
    wk = jax.random.normal(k_wk, (D, D3), jnp.float32) * math.sqrt(2.0 / D3)
    wv = jax.random.normal(k_wv, (D, D3), jnp.float32) * math.sqrt(2.0 / D3)
    params = (wq.T, wk.T, wv.T)       # pre-transpose so kernel does x @ W

    length = jnp.full((B,), Se, jnp.int32)   # unused in qkv_diff=True branch

    out_he, out_hl, out_hi, out_hm = self_attention_layer(
        h_e, h_l, h_i, h_m, length, params)
    jax.block_until_ready(out_he)

    # Pure-JAX reference for correctness.
    h_c = jnp.concatenate([h_l, h_i, h_m], axis=1)
    Q = h_e @ wq.T
    K = h_c @ wk.T
    V = h_c @ wv.T
    S = jnp.matmul(Q, jnp.swapaxes(K, -1, -2)) / math.sqrt(K.shape[-1])
    ref = h_e + jnp.matmul(jax.nn.softmax(S, axis=-1), V)

    # Tolerance covers pl.reciprocal(approx=True) in the softmax denominator
    # (EUP approximate reciprocal, ~1e-3-level relative error).
    assert jnp.allclose(out_he, ref, atol=2e-2, rtol=2e-2), "mismatch vs reference"
    assert out_hl is h_l and out_hi is h_i and out_hm is h_m

    print("KERNEL_OK")
</pallas_src>

<mosaic_0001>
module attributes {stable_mosaic.version = 11 : i64} {
  func.func @_self_attention_kernel(%arg0: i32, %arg1: memref<2x8x8xf32, #tpu.memory_space<vmem>>, %arg2: memref<2x2x24xf32, #tpu.memory_space<vmem>>, %arg3: memref<2x3x24xf32, #tpu.memory_space<vmem>>, %arg4: memref<2x3x24xf32, #tpu.memory_space<vmem>>, %arg5: memref<8x8xf32, #tpu.memory_space<vmem>>, %arg6: memref<24x16xf32, #tpu.memory_space<vmem>>, %arg7: memref<2x8x8xf32, #tpu.memory_space<vmem>>) attributes {dimension_semantics = [#tpu.dimension_semantics<parallel>], iteration_bounds = array<i64: 1>, scalar_prefetch = 0 : i64, scratch_operands = 0 : i64, tpu.core_type = #tpu.core_type<tc>, window_params = [{transform_indices = @transform_0, window_bounds = array<i64: 2, 8, 8>}, {transform_indices = @transform_1, window_bounds = array<i64: 2, 2, 24>}, {transform_indices = @transform_2, window_bounds = array<i64: 2, 3, 24>}, {transform_indices = @transform_3, window_bounds = array<i64: 2, 3, 24>}, {pipeline_mode = #tpu.pipeline_mode<synchronous>, transform_indices = @transform_4, window_bounds = array<i64: 8, 8>}, {pipeline_mode = #tpu.pipeline_mode<synchronous>, transform_indices = @transform_5, window_bounds = array<i64: 24, 16>}, {transform_indices = @transform_6, window_bounds = array<i64: 2, 8, 8>}]} {
    %c0 = arith.constant 0 : index
    %c0_0 = arith.constant 0 : index
    %c0_1 = arith.constant 0 : index
    %0 = vector.load %arg1[%c0, %c0_0, %c0_1] : memref<2x8x8xf32, #tpu.memory_space<vmem>>, vector<2x8x8xf32>
    %c0_2 = arith.constant 0 : index
    %c0_3 = arith.constant 0 : index
    %c0_4 = arith.constant 0 : index
    %1 = vector.load %arg2[%c0_2, %c0_3, %c0_4] : memref<2x2x24xf32, #tpu.memory_space<vmem>>, vector<2x2x24xf32>
    %c0_5 = arith.constant 0 : index
    %c0_6 = arith.constant 0 : index
    %c0_7 = arith.constant 0 : index
    %2 = vector.load %arg3[%c0_5, %c0_6, %c0_7] : memref<2x3x24xf32, #tpu.memory_space<vmem>>, vector<2x3x24xf32>
    %c0_8 = arith.constant 0 : index
    %c0_9 = arith.constant 0 : index
    %c0_10 = arith.constant 0 : index
    %3 = vector.load %arg4[%c0_8, %c0_9, %c0_10] : memref<2x3x24xf32, #tpu.memory_space<vmem>>, vector<2x3x24xf32>
    %4 = tpu.concatenate %1, %2, %3 in 1 : vector<2x2x24xf32>, vector<2x3x24xf32>, vector<2x3x24xf32> -> vector<2x8x24xf32>
    %5 = vector.shape_cast %0 : vector<2x8x8xf32> to vector<16x8xf32>
    %c0_11 = arith.constant 0 : index
    %c0_12 = arith.constant 0 : index
    %6 = vector.load %arg5[%c0_11, %c0_12] : memref<8x8xf32, #tpu.memory_space<vmem>>, vector<8x8xf32>
    %cst = arith.constant dense<0.000000e+00> : vector<16x8xf32>
    %7 = tpu.matmul %5, %6, %cst {dimension_numbers = #tpu.dot_dimension_numbers<[1], [0], [0], [1], [0, 0, 1, 1], [], []>} : vector<16x8xf32>, vector<8x8xf32>, vector<16x8xf32> -> vector<16x8xf32>
    %8 = vector.shape_cast %4 : vector<2x8x24xf32> to vector<16x24xf32>
    %c0_13 = arith.constant 0 : index
    %c0_14 = arith.constant 0 : index
    %9 = vector.load %arg6[%c0_13, %c0_14] : memref<24x16xf32, #tpu.memory_space<vmem>>, vector<24x16xf32>
    %cst_15 = arith.constant dense<0.000000e+00> : vector<16x16xf32>
    %10 = tpu.matmul %8, %9, %cst_15 {dimension_numbers = #tpu.dot_dimension_numbers<[1], [0], [0], [1], [0, 0, 1, 1], [], []>} : vector<16x24xf32>, vector<24x16xf32>, vector<16x16xf32> -> vector<16x16xf32>
    %11 = vector.shape_cast %7 : vector<16x8xf32> to vector<2x8x8xf32>
    %12 = vector.shape_cast %10 : vector<16x16xf32> to vector<2x8x16xf32>
    %13 = vector.extract_strided_slice %12 {offsets = [0, 0, 0], sizes = [2, 8, 8], strides = [1, 1, 1]} : vector<2x8x16xf32> to vector<2x8x8xf32>
    %14 = vector.extract_strided_slice %12 {offsets = [0, 0, 8], sizes = [2, 8, 8], strides = [1, 1, 1]} : vector<2x8x16xf32> to vector<2x8x8xf32>
    "tpu.trace_start"() <{level = 10 : i32, message = "bqd,bkd->bqk"}> : () -> ()
    %cst_16 = arith.constant dense<0.000000e+00> : vector<2x8x8xf32>
    %15 = tpu.matmul %11, %13, %cst_16 {dimension_numbers = #tpu.dot_dimension_numbers<[2], [2], [1], [1], [0, 0, 0, 1, 1, 1], [0], [0]>} : vector<2x8x8xf32>, vector<2x8x8xf32>, vector<2x8x8xf32> -> vector<2x8x8xf32>
    "tpu.trace_stop"() : () -> ()
    %cst_17 = arith.constant dense<0xFF800000> : vector<2x8xf32>
    %16 = vector.multi_reduction <maximumf>, %15, %cst_17 [2] : vector<2x8x8xf32> to vector<2x8xf32>
    %17 = vector.shape_cast %16 : vector<2x8xf32> to vector<2x8x1xf32>
    %18 = vector.broadcast %17 : vector<2x8x1xf32> to vector<2x8x8xf32>
    %19 = arith.subf %15, %18 : vector<2x8x8xf32>
    %20 = math.exp %19 : vector<2x8x8xf32>
    %cst_18 = arith.constant dense<0.000000e+00> : vector<2x8xf32>
    %21 = vector.multi_reduction <add>, %20, %cst_18 [2] : vector<2x8x8xf32> to vector<2x8xf32>
    %22 = vector.shape_cast %21 : vector<2x8xf32> to vector<2x8x1xf32>
    %23 = tpu.reciprocal %22 {approx = true} : vector<2x8x1xf32> -> vector<2x8x1xf32>
    %24 = vector.broadcast %23 : vector<2x8x1xf32> to vector<2x8x8xf32>
    %25 = arith.mulf %20, %24 : vector<2x8x8xf32>
    "tpu.trace_start"() <{level = 10 : i32, message = "bqk,bkd->bqd"}> : () -> ()
    %cst_19 = arith.constant dense<0.000000e+00> : vector<2x8x8xf32>
    %26 = tpu.matmul %25, %14, %cst_19 {dimension_numbers = #tpu.dot_dimension_numbers<[2], [1], [1], [2], [0, 0, 0, 1, 1, 2], [0], [0]>} : vector<2x8x8xf32>, vector<2x8x8xf32>, vector<2x8x8xf32> -> vector<2x8x8xf32>
    "tpu.trace_stop"() : () -> ()
    %27 = arith.addf %0, %26 : vector<2x8x8xf32>
    %c0_20 = arith.constant 0 : index
    %c0_21 = arith.constant 0 : index
    %c0_22 = arith.constant 0 : index
    %28 = vector.load %arg7[%c0_20, %c0_21, %c0_22] : memref<2x8x8xf32, #tpu.memory_space<vmem>>, vector<2x8x8xf32>
    tpu.vector_store %arg7[%c0_20, %c0_21, %c0_22], %27 {strides = array<i32>} : memref<2x8x8xf32, #tpu.memory_space<vmem>>, vector<2x8x8xf32>,
    return
  }
  func.func @transform_0(%arg0: i32) -> (i32, i32, i32) {
    %c0_i32 = arith.constant 0 : i32
    %c0_i32_0 = arith.constant 0 : i32
    %c0_i32_1 = arith.constant 0 : i32
    return %arg0, %c0_i32, %c0_i32_0 : i32, i32, i32
  }
  func.func @transform_1(%arg0: i32) -> (i32, i32, i32) {
    %c0_i32 = arith.constant 0 : i32
    %c0_i32_0 = arith.constant 0 : i32
    %c0_i32_1 = arith.constant 0 : i32
    return %arg0, %c0_i32, %c0_i32_0 : i32, i32, i32
  }
  func.func @transform_2(%arg0: i32) -> (i32, i32, i32) {
    %c0_i32 = arith.constant 0 : i32
    %c0_i32_0 = arith.constant 0 : i32
    %c0_i32_1 = arith.constant 0 : i32
    return %arg0, %c0_i32, %c0_i32_0 : i32, i32, i32
  }
  func.func @transform_3(%arg0: i32) -> (i32, i32, i32) {
    %c0_i32 = arith.constant 0 : i32
    %c0_i32_0 = arith.constant 0 : i32
    %c0_i32_1 = arith.constant 0 : i32
    return %arg0, %c0_i32, %c0_i32_0 : i32, i32, i32
  }
  func.func @transform_4(%arg0: i32) -> (i32, i32) {
    %c0_i32 = arith.constant 0 : i32
    %c0_i32_0 = arith.constant 0 : i32
    %c0_i32_1 = arith.constant 0 : i32
    return %c0_i32, %c0_i32_0 : i32, i32
  }
  func.func @transform_5(%arg0: i32) -> (i32, i32) {
    %c0_i32 = arith.constant 0 : i32
    %c0_i32_0 = arith.constant 0 : i32
    %c0_i32_1 = arith.constant 0 : i32
    return %c0_i32, %c0_i32_0 : i32, i32
  }
  func.func @transform_6(%arg0: i32) -> (i32, i32, i32) {
    %c0_i32 = arith.constant 0 : i32
    %c0_i32_0 = arith.constant 0 : i32
    %c0_i32_1 = arith.constant 0 : i32
    return %arg0, %c0_i32, %c0_i32_0 : i32, i32, i32
  }
}

</mosaic_0001>

<bundles_post_ra>
// kernel: tpu_custom_call.1
= control target key start
LH: loop header
LB: loop body
LE: loop exit
PB: predicated region body
PF: predicated region fallthrough
CT: control target
= control target key end

     0   :  { %vm51_vm0 = vcmask 64512   ;;  %vm44_vm1 = vcmask 1041408   ;;  %vm47_vm2 = vcmask 1044480   ;;  %vm136_vm3 = vcmask 195584   ;;  %s781_s0 = inlined_call_operand.vmem [shape: f32[2,8,8], index: 0, kind: input, shape index: {}]   ;;  %s782_s1 = inlined_call_operand.vmem [shape: f32[2,2,24], index: 1, kind: input, shape index: {}]   ;;  %s783_s2 = inlined_call_operand.vmem [shape: f32[2,3,24], index: 2, kind: input, shape index: {}]   ;;  %s784_s3 = inlined_call_operand.vmem [shape: f32[2,3,24], index: 3, kind: input, shape index: {}]   ;;  %s785_s4 = inlined_call_operand.vmem [shape: f32[8,8], index: 4, kind: input, shape index: {}]   ;;  %s786_s5 = inlined_call_operand.vmem [shape: f32[24,16], index: 5, kind: input, shape index: {}]   ;;  %s787_s6 = inlined_call_operand.hbm [shape: f32[2,8,8], index: 6, kind: output, shape index: {}]  }
   0x1   :  { %v50_v0 = vld [vmem:[%s785_s4] sm:$0xff]  ;;  %v718_v2 = vld [vmem:[%s781_s0 + $0x8] sm:$0xff]  ;;  %v135_v5 = vld [vmem:[%s786_s5 + $0x10] sm:$0xff] }
   0x2   :  { %v713_v1 = vld [vmem:[%s781_s0] sm:$0xff]  ;;  %590 = vmatprep.subr.mxu1 %v50_v0  ;;  %v134_v4 = vld [vmem:[%s786_s5 + $0x8] sm:$0xff] }
   0x3   :  { %592 = vmatprep.mubr.msk.f32.mxu1 %vm51_vm0, %v713_v1  ;;  %v133_v3 = vld [vmem:[%s786_s5] sm:$0xff]  ;;  %591 = vmatpush3.msra.mxu1 %v50_v0 }
   0x4   :  { %v624_v6 = vpack.c.bf16 %v134_v4, %v133_v3  ;;  %v26_v7 = vld [vmem:[%s782_s1] sm:$0x3]  ;;  %593 = vmatmul.mubr.msk.f32.vlgmr.msra.gmra.mrb[0].mxu1 %vm51_vm0, %v718_v2  ;;  %v27_v12 = vld [vmem:[%s782_s1 + $0x2] sm:$0x3]  ;;  %v29_v13 = vld [vmem:[%s783_s2 + $0x4] sm:$0x7] }
   0x5   :  { %v28_v8 = vld [vmem:[%s783_s2] sm:$0x7]  ;;  %v31_v14 = vld [vmem:[%s784_s3 + $0x4] sm:$0x7]  ;;  %v35_v15 = vrot.slane %v29_v13, 6 }
   0x6   :  { %v30_v9 = vld [vmem:[%s784_s3] sm:$0x7]  ;;  %v34_v10 = vrot.slane %v28_v8, 6  ;;  %625 = vmatprep.subr.bf16.mxu1 %v624_v6 }
   0x7   :  { %v40_v11 = vrot.slane %v30_v9, 3 }
   0x8   :  { %11 = vsyncpa [#allocation3], 0  ;;  %627 = vmatpush3.bf16.msra.mxu1 %v624_v6  ;;  %v45_v16 = vsel %vm44_vm1, %v26_v7, %v34_v10  ;;  %v41_v17 = vrot.slane %v31_v14, 3  ;;  %v46_v19 = vsel %vm44_vm1, %v27_v12, %v35_v15  ;;  %v666_v21 = vmov 0.0   ;;  %s668_s1 = smov 120   ;;  %s669_s2 = smov [#allocation2]  }
   0x9   :  { %599 = vmatprep.subr.mxu1 %v135_v5  ;;  %v48_v18 = vsel %vm47_vm2, %v45_v16, %v40_v11  ;;  %604 = vmatprep.subr.mxu0 %v666_v21  ;;  %vm667_vm4 = vmmov 0   ;;  %s553_s3 = sshll.u32 %s669_s2, 4  ;;  %s554_s3 = int_to_ptr.vmem [resolvable:$true] %s553_s3 }
   0xa   :  { %601 = vmatprep.mubr.msk.f32.mxu1 %vm136_vm3, %v48_v18  ;;  %v49_v20 = vsel %vm47_vm2, %v46_v19, %v41_v17  ;;  %606 = vmatprep.mubr.msk.f32.mxu0 %vm667_vm4, %v666_v21  ;;  %s642_s18 = scalar_lea.vmem %s554_s3, 256  ;;  %p647_p1 = scmp.lt.s32.totalorder %s554_s3, %s554_s3 }
   0xb   :  { %p643_p0 = scmp.ne.s32.totalorder %s554_s3, %s642_s18  ;;  %p648_p2 = scmp.lt.s32.totalorder %s642_s18, %s642_s18 }
   0xc   :  { %600 = vmatpush3.msra.mxu1 %v135_v5 }
   0xd   :  { %602 = vmatmul.mubr.msk.f32.vlgmr.msra.gmra.mrb[2].mxu1 %vm136_vm3, %v49_v20  ;;  %614 = vmatprep.subr.mxu1 %v666_v21  ;;  %p649_p3 = por %p648_p2, %p647_p1 }
   0xe   :  { %616 = vmatprep.mubr.msk.f32.mxu1 %vm667_vm4, %v666_v21 }
   0xf   :  { %p650_p4 = pnand %p649_p3, %p643_p0 }
  0xd7   :  { %v594_v22 = vpop.f32.mrb[0].mxu1 }
  0xd8   :  { %v124_v23 = vpop.f32.mrb[1].mxu1 }
  0xe0   :  { %v603_v24 = vpop.f32.mrb[2].mxu1 }
  0xe1   :  { %v209_v25 = vpop.f32.mrb[3].mxu1 }
  0xe2   :  { %605 = vmatpush3.xpose.msk.msra.mxu0 %vm51_vm0, %v209_v25 }
  0xe3   :  { %609 = vmatprep.subr.mxu0 %v666_v21 }
  0xe5   :  { %607 = vmatmul.mubr.msk.f32.vlgmr.msra.gmra.mrb[0].mxu0 %vm51_vm0, %v124_v23 }
  0xe6   :  { %610 = vmatpush3.xpose.msk.msra.mxu0 %vm51_vm0, %v603_v24  ;;  %611 = vmatprep.mubr.msk.f32.mxu0 %vm667_vm4, %v666_v21 }
  0xe7   :  { %619 = vmatprep.subr.mxu0 %v666_v21 }
  0xe9   :  { %612 = vmatmul.mubr.msk.f32.vlgmr.msra.gmra.mrb[2].mxu0 %vm51_vm0, %v594_v22 }
  0xea   :  { %621 = vmatprep.mubr.msk.f32.mxu0 %vm667_vm4, %v666_v21 }
 0x1b8   :  { %v290_v26 = vpop.f32.mrb[0].mxu0 }
 0x1b9   :  { %v608_v27 = vpop.f32.mrb[1].mxu0  ;;  %v370_v28 = vsel %vm51_vm0, %v290_v26, -inf }
 0x1ba   :  { %371 = vmax.xlane.f32.xlu0 %v370_v28 }
 0x1bc   :  { %v366_v29 = vpop.f32.mrb[2].mxu0 }
 0x1bd   :  { %v613_v30 = vpop.f32.mrb[3].mxu0  ;;  %v373_v31 = vsel %vm51_vm0, %v366_v29, -inf }
 0x1be   :  { %374 = vmax.xlane.f32.xlu0 %v373_v31 }
 0x1d4   :  { %392 = vrot.lane.b32.xlu0 %v209_v25, %s668_s1 }
 0x247   :  { %v372_v32 = vpop.xlane.xlu0 %371 }
 0x248   :  { %v376_v33 = vsub.f32 %v290_v26, %v372_v32 }
 0x24a   :  { %v378_v34 = vmul.f32 1.442695, %v376_v33 }
 0x24b   :  { %v375_v35 = vpop.xlane.xlu0 %374 }
 0x24c   :  { %634 = vpow2.f32 %v378_v34  ;;  %v377_v36 = vsub.f32 %v366_v29, %v375_v35 }
 0x24e   :  { %v380_v37 = vmul.f32 1.442695, %v377_v36 }
 0x24f   :  { %v393_v38 = vpop.permute.xlu0 %392 }
 0x250   :  { %636 = vpow2.f32 %v380_v37  ;;  %615 = vmatpush3.msra.mxu1 %v393_v38 }
 0x256   :  { %v635_v39 = vpop.eup %634 }
 0x257   :  { %v382_v40 = vsel %vm51_vm0, %v635_v39, 0.0 }
 0x258   :  { %383 = vadd.xlane.f32.xlu1 %v382_v40 }
 0x25a   :  { %v637_v41 = vpop.eup %636 }
 0x25b   :  { %v385_v42 = vsel %vm51_vm0, %v637_v41, 0.0 }
 0x25c   :  { %386 = vadd.xlane.f32.xlu1 %v385_v42 }
 0x26d   :  { %468 = vrot.lane.b32.xlu1 %v603_v24, %s668_s1 }
 0x2e5   :  { %v384_v43 = vpop.xlane.xlu1 %383 }
 0x2e6   :  { %638 = vrcp.f32 %v384_v43 }
 0x2e9   :  { %v387_v44 = vpop.xlane.xlu1 %386 }
 0x2ea   :  { %640 = vrcp.f32 %v387_v44 }
 0x2ed   :  { %v469_v45 = vpop.permute.xlu1 %468 }
 0x2ee   :  { %620 = vmatpush3.msra.mxu0 %v469_v45 }
 0x2f0   :  { %v639_v46 = vpop.eup %638 }
 0x2f1   :  { %v390_v47 = vmul.f32 %v639_v46, %v635_v39 }
 0x2f3   :  { %617 = vmatmul.mubr.msk.f32.vlgmr.msra.gmra.mrb[4].mxu1 %vm51_vm0, %v390_v47 }
 0x2f4   :  { %v641_v48 = vpop.eup %640 }
 0x2f5   :  { %v391_v49 = vmul.f32 %v641_v48, %v637_v41 }
 0x2f7   :  { %622 = vmatmul.mubr.msk.f32.vlgmr.msra.gmra.mrb[4].mxu0 %vm51_vm0, %v391_v49 }
 0x3c6   :  { %v464_v50 = vpop.f32.mrb[4].mxu1 }
 0x3c7   :  { %v544_v51 = vadd.f32 %v464_v50, %v713_v1  ;;  %v618_v52 = vpop.f32.mrb[5].mxu1 }
 0x3c9   :  { %546 = vst.msk [vmem:[#allocation2] sm:$0xff] %vm51_vm0, %v544_v51 }
 0x3ca   :  { %v540_v53 = vpop.f32.mrb[4].mxu0 }
 0x3cb   :  { %v545_v54 = vadd.f32 %v540_v53, %v718_v2  ;;  %v623_v55 = vpop.f32.mrb[5].mxu0 }
 0x3cd   :  { %547 = vst.msk [vmem:[#allocation2 + $0x8] sm:$0xff] %vm51_vm0, %v545_v54 }
 0x3ce   :  { %653 = shalt.err (!%p650_p4)
}
 0x3cf   :  { %s654_s21 = scalar_lea.hbm %s787_s6, 256 }
 0x3d0   :  { %p655_p5 = scmp.ne.s32.totalorder %s787_s6, %s654_s21  ;;  %p658_p6 = scmp.lt.u32.totalorder %s654_s21, %s787_s6 }
 0x3d2   :  { %p660_p7 = pnand %p658_p6, %p655_p5 }
 0x3d4   :  { %663 = shalt.err (!%p660_p7)
}
 0x3d5   :  { %s670_s26 = smov 128   ;;  %s671_s27 = smov 8  }
 0x3d6   :  { %559 = dma.vmem_to_hbm [thread:$0]  %s554_s3, 256, %s787_s6, [#allocation3], %s670_s26, %s670_s26, %s671_s27  }
 0x3d7   :  { %664 = dma.done.wait [#allocation3], 256  }
 0x3d8   :  { %665 = vsyncadd [#allocation3], 4294967040 }
 0x3d9   :  { %563 = vsyncpa [#allocation3], 1 }

</bundles_post_ra>
